<compile_context>
chip_gen: v7x
topology: tpu7x:2x2x1
jax: 0.10.0
libtpu: 0.0.40
codegen_flags: <defaults>
</compile_context>

<pallas_src>
import functools

import jax
import jax.numpy as jnp
from jax.experimental import pallas as pl
from jax.experimental.pallas import tpu as pltpu

# Combined native-dtype HBM bytes (both inputs) per grid step. 4 MiB/step -> 8 MiB of
# double-buffered input VMEM + tiny folded accumulators; vmem_limit raised to 32 MiB below.
_TARGET_STEP_BYTES = 4 << 20


def _loss_kernel(tail_rows, yhat_ref, y_ref, out_ref, acc_loss_ref, acc_cnt_ref):
    """Streamed masked-BCE partial sums.

    tail_rows (static): number of real rows in the last row-block (== br when not ragged).
    """
    i = pl.program_id(0)
    last = pl.num_programs(0) - 1
    br, C = yhat_ref.shape
    acc_rows = acc_loss_ref.shape[0]
    ragged = tail_rows != br  # static

    @pl.when(i == 0)
    def _init():
        acc_loss_ref[...] = jnp.zeros_like(acc_loss_ref)
        acc_cnt_ref[...] = jnp.zeros_like(acc_cnt_ref)

    def accumulate(mask_tail):
        x = yhat_ref[...].astype(jnp.float32)
        y = y_ref[...].astype(jnp.float32)

        # Numerically-stable BCE-with-logits specialized to labels in {-1, 0, +1}:
        #   softplus(-y*x) = max(-y*x, 0) + log1p(exp(-|x|))
        # (exact for |y| == 1; y == 0 rows are masked out below, their value is irrelevant.
        #  General-label form would be max(x,0) - x*(y+1)/2 + log1p(exp(-|x|)).)
        loss = jnp.maximum((-x) * y, 0.0) + jnp.log1p(jnp.exp(-jnp.abs(x)))
        valid = (y * y) > 0.0  # == reference isvalid = y**2 > 0

        if mask_tail:
            # Ragged last row-block: out-of-bounds rows hold garbage and must not contribute.
            row = jax.lax.broadcasted_iota(jnp.int32, x.shape, 0)
            valid = valid & (row < tail_rows)

        # Select (not multiply-by-mask) so garbage / NaN logits on masked entries yield 0,
        # exactly like the reference torch.where.
        lm = jnp.where(valid, loss, 0.0)
        cm = valid.astype(jnp.float32)

        if acc_rows != br:
            # Fold the block contribution down to (8, C) with pure VALU vreg adds so the
            # accumulator read-modify-write is br/8-times cheaper than the input stream.
            lm = lm.reshape(br // acc_rows, acc_rows, C).sum(axis=0)
            cm = cm.reshape(br // acc_rows, acc_rows, C).sum(axis=0)

        acc_loss_ref[...] += lm
        acc_cnt_ref[...] += cm

    @pl.when(i != last)
    def _full_blocks():
        accumulate(mask_tail=False)  # fast path: no bounds masking on the hot loop

    @pl.when(i == last)
    def _tail_block():
        accumulate(mask_tail=ragged)
        # Single cross-lane reduce for the whole kernel; divide happens in the wrapper.
        out_ref[0] = jnp.sum(acc_loss_ref[...])
        out_ref[1] = jnp.sum(acc_cnt_ref[...])


def _collapse(yhat, y):
    """Collapse to 2-D, preferring a lane-dense (rows, 128*k) layout (free reshape)."""
    n = yhat.size
    for width in (2048, 1024, 512, 256, 128):
        if n % width == 0:
            return yhat.reshape(-1, width), y.reshape(-1, width)
    # Fallback: keep the trailing dim (lane padding <= 127 elements per row).
    if yhat.ndim <= 1:
        return yhat.reshape(1, -1), y.reshape(1, -1)
    return yhat.reshape(-1, yhat.shape[-1]), y.reshape(-1, y.shape[-1])


@functools.partial(jax.jit, static_argnames=("block_rows",))
def classification_loss(yhat, y, *, block_rows=None):
    """loss.sum() / isvalid.sum() — same semantics as the PyTorch ClassificationLoss."""
    yhat2, y2 = _collapse(yhat, y)
    R, C = yhat2.shape

    # Rows per block, sized from the actual input itemsizes (native-dtype streaming).
    bytes_per_row = C * (jnp.dtype(yhat2.dtype).itemsize + jnp.dtype(y2.dtype).itemsize)
    if block_rows is None:
        br = max(8, (_TARGET_STEP_BYTES // bytes_per_row) // 8 * 8)
    else:
        br = max(8, (block_rows // 8) * 8)
    if br >= R:
        br = R  # single row-block; a full-extent block dim is always legal

    grid_len = pl.cdiv(R, br)
    tail_rows = R - (grid_len - 1) * br          # real rows in the last block (static)
    acc_rows = 8 if (br % 8 == 0) else br        # fold target for the accumulators

    sums = pl.pallas_call(
        functools.partial(_loss_kernel, tail_rows),
        out_shape=jax.ShapeDtypeStruct((2,), jnp.float32),
        grid_spec=pltpu.PrefetchScalarGridSpec(
            num_scalar_prefetch=0,
            grid=(grid_len,),
            in_specs=[
                pl.BlockSpec((br, C), lambda i: (i, 0)),
                pl.BlockSpec((br, C), lambda i: (i, 0)),
            ],
            out_specs=pl.BlockSpec(memory_space=pltpu.MemorySpace.SMEM),
            scratch_shapes=[
                pltpu.VMEM((acc_rows, C), jnp.float32),  # folded masked-loss accumulator
                pltpu.VMEM((acc_rows, C), jnp.float32),  # folded valid-count accumulator
            ],
        ),
        compiler_params=pltpu.CompilerParams(
            dimension_semantics=("arbitrary",),          # sequential accumulation over row-blocks
            vmem_limit_bytes=32 * 1024 * 1024,
        ),
    )(yhat2, y2)
    return sums[0] / sums[1]


def _reference_loss(yhat, y):
    x = yhat.reshape(-1).astype(jnp.float32)
    yy = y.reshape(-1).astype(jnp.float32)
    t = (yy + 1.0) * 0.5
    loss = jnp.maximum(x, 0.0) - x * t + jnp.log1p(jnp.exp(-jnp.abs(x)))
    valid = (yy * yy) > 0.0
    return jnp.where(valid, loss, 0.0).sum() / valid.sum()


if __name__ == "__main__":
    key = jax.random.PRNGKey(0)
    k1, k2, k3, k4, k5, k6 = jax.random.split(key, 6)

    # Module-consistent use: batch of 2 x 1000 binary tasks, labels in {-1, 0, +1}
    # (0 == unlabeled); the batch dict mirrors ClassificationLoss.forward.
    task = "tox"
    pred = jax.random.normal(k1, (2, 1000), dtype=jnp.float32)
    true = jax.random.randint(k2, (2, 1000), -1, 2).astype(jnp.float32)
    batch = {f"{task}/pred": pred, f"{task}/true": true}

    loss = jax.block_until_ready(
        classification_loss(batch[f"{task}/pred"], batch[f"{task}/true"]))
    ref = jax.block_until_ready(_reference_loss(pred, true))
    assert jnp.allclose(loss, ref, rtol=1e-5, atol=1e-5), (loss, ref)

    # Mixed low-precision dtypes (bf16 logits, int8 labels), multi-block grid with a ragged
    # last row-block — exercises the fold-to-(8,C) accumulator and the bounds-masked tail.
    pred2 = jax.random.normal(k3, (300, 130), dtype=jnp.bfloat16)
    true2 = jax.random.randint(k4, (300, 130), -1, 2).astype(jnp.int8)
    loss2 = jax.block_until_ready(classification_loss(pred2, true2, block_rows=64))
    ref2 = jax.block_until_ready(_reference_loss(pred2, true2))
    assert jnp.allclose(loss2, ref2, rtol=1e-4, atol=1e-5), (loss2, ref2)

    # Lane-dense repack path: total size divisible by 128 -> streamed as (rows, 2048)
    # regardless of the original trailing dim; multi-block fast path, folded, non-ragged tail.
    pred3 = jax.random.normal(k5, (2, 64, 512), dtype=jnp.bfloat16)
    true3 = jax.random.randint(k6, (2, 64, 512), -1, 2).astype(jnp.float32)
    loss3 = jax.block_until_ready(classification_loss(pred3, true3, block_rows=16))
    ref3 = jax.block_until_ready(_reference_loss(pred3, true3))
    assert jnp.allclose(loss3, ref3, rtol=1e-4, atol=1e-5), (loss3, ref3)

    print("KERNEL_OK")
</pallas_src>

<mosaic_0001>
module attributes {stable_mosaic.version = 11 : i64} {
  func.func @_loss_kernel(%arg0: i32, %arg1: memref<2x1000xf32, #tpu.memory_space<vmem>>, %arg2: memref<2x1000xf32, #tpu.memory_space<vmem>>, %arg3: memref<2xf32, #tpu.memory_space<smem>>, %arg4: memref<2x1000xf32, #tpu.memory_space<vmem>>, %arg5: memref<2x1000xf32, #tpu.memory_space<vmem>>) attributes {dimension_semantics = [#tpu.dimension_semantics<arbitrary>], iteration_bounds = array<i64: 1>, scalar_prefetch = 0 : i64, scratch_operands = 2 : i64, tpu.core_type = #tpu.core_type<tc>, window_params = [{transform_indices = @transform_0, window_bounds = array<i64: 2, 1000>}, {transform_indices = @transform_1, window_bounds = array<i64: 2, 1000>}, {transform_indices = @transform_2, window_bounds = array<i64: 2>}]} {
    %c0_i32 = arith.constant 0 : i32
    %0 = arith.cmpi eq, %arg0, %c0_i32 : i32
    %1 = arith.extui %0 : i1 to i32
    %c0_i32_0 = arith.constant 0 : i32
    %2 = arith.cmpi ne, %1, %c0_i32_0 : i32
    scf.if %2 {
      %cst = arith.constant 0.000000e+00 : f32
      %9 = vector.broadcast %cst : f32 to vector<2x1000xf32>
      %c0 = arith.constant 0 : index
      %c0_5 = arith.constant 0 : index
      %10 = vector.load %arg4[%c0, %c0_5] : memref<2x1000xf32, #tpu.memory_space<vmem>>, vector<2x1000xf32>
      tpu.vector_store %arg4[%c0, %c0_5], %9 {strides = array<i32>} : memref<2x1000xf32, #tpu.memory_space<vmem>>, vector<2x1000xf32>,
      %cst_6 = arith.constant 0.000000e+00 : f32
      %11 = vector.broadcast %cst_6 : f32 to vector<2x1000xf32>
      %c0_7 = arith.constant 0 : index
      %c0_8 = arith.constant 0 : index
      %12 = vector.load %arg5[%c0_7, %c0_8] : memref<2x1000xf32, #tpu.memory_space<vmem>>, vector<2x1000xf32>
      tpu.vector_store %arg5[%c0_7, %c0_8], %11 {strides = array<i32>} : memref<2x1000xf32, #tpu.memory_space<vmem>>, vector<2x1000xf32>,
    } else {
    }
    %c0_i32_1 = arith.constant 0 : i32
    %3 = arith.cmpi ne, %arg0, %c0_i32_1 : i32
    %4 = arith.extui %3 : i1 to i32
    %c0_i32_2 = arith.constant 0 : i32
    %5 = arith.cmpi ne, %4, %c0_i32_2 : i32
    scf.if %5 {
      %c0 = arith.constant 0 : index
      %c0_5 = arith.constant 0 : index
      %9 = vector.load %arg1[%c0, %c0_5] : memref<2x1000xf32, #tpu.memory_space<vmem>>, vector<2x1000xf32>
      %c0_6 = arith.constant 0 : index
      %c0_7 = arith.constant 0 : index
      %10 = vector.load %arg2[%c0_6, %c0_7] : memref<2x1000xf32, #tpu.memory_space<vmem>>, vector<2x1000xf32>
      %cst = arith.constant 0.000000e+00 : f32
      %11 = vector.broadcast %cst : f32 to vector<2x1000xf32>
      %12 = arith.subf %11, %9 : vector<2x1000xf32>
      %13 = arith.mulf %12, %10 : vector<2x1000xf32>
      %cst_8 = arith.constant 0.000000e+00 : f32
      %14 = vector.broadcast %cst_8 : f32 to vector<2x1000xf32>
      %15 = arith.maximumf %13, %14 : vector<2x1000xf32>
      %16 = math.absf %9 : vector<2x1000xf32>
      %cst_9 = arith.constant 0.000000e+00 : f32
      %17 = vector.broadcast %cst_9 : f32 to vector<2x1000xf32>
      %18 = arith.subf %17, %16 : vector<2x1000xf32>
      %19 = math.exp %18 : vector<2x1000xf32>
      %20 = math.log1p %19 : vector<2x1000xf32>
      %21 = arith.addf %15, %20 : vector<2x1000xf32>
      %22 = arith.mulf %10, %10 : vector<2x1000xf32>
      %cst_10 = arith.constant 0.000000e+00 : f32
      %23 = vector.broadcast %cst_10 : f32 to vector<2x1000xf32>
      %24 = arith.cmpf ogt, %22, %23 : vector<2x1000xf32>
      %cst_11 = arith.constant 0.000000e+00 : f32
      %25 = vector.broadcast %cst_11 : f32 to vector<2x1000xf32>
      %26 = arith.select %24, %21, %25 : vector<2x1000xi1>, vector<2x1000xf32>
      %27 = arith.extui %24 : vector<2x1000xi1> to vector<2x1000xi32>
      %28 = arith.sitofp %27 : vector<2x1000xi32> to vector<2x1000xf32>
      %c0_12 = arith.constant 0 : index
      %c0_13 = arith.constant 0 : index
      %29 = vector.load %arg4[%c0_12, %c0_13] : memref<2x1000xf32, #tpu.memory_space<vmem>>, vector<2x1000xf32>
      %30 = arith.addf %29, %26 : vector<2x1000xf32>
      %c0_14 = arith.constant 0 : index
      %c0_15 = arith.constant 0 : index
      %31 = vector.load %arg4[%c0_14, %c0_15] : memref<2x1000xf32, #tpu.memory_space<vmem>>, vector<2x1000xf32>
      tpu.vector_store %arg4[%c0_14, %c0_15], %30 {strides = array<i32>} : memref<2x1000xf32, #tpu.memory_space<vmem>>, vector<2x1000xf32>,
      %c0_16 = arith.constant 0 : index
      %c0_17 = arith.constant 0 : index
      %32 = vector.load %arg5[%c0_16, %c0_17] : memref<2x1000xf32, #tpu.memory_space<vmem>>, vector<2x1000xf32>
      %33 = arith.addf %32, %28 : vector<2x1000xf32>
      %c0_18 = arith.constant 0 : index
      %c0_19 = arith.constant 0 : index
      %34 = vector.load %arg5[%c0_18, %c0_19] : memref<2x1000xf32, #tpu.memory_space<vmem>>, vector<2x1000xf32>
      tpu.vector_store %arg5[%c0_18, %c0_19], %33 {strides = array<i32>} : memref<2x1000xf32, #tpu.memory_space<vmem>>, vector<2x1000xf32>,
    } else {
    }
    %c0_i32_3 = arith.constant 0 : i32
    %6 = arith.cmpi eq, %arg0, %c0_i32_3 : i32
    %7 = arith.extui %6 : i1 to i32
    %c0_i32_4 = arith.constant 0 : i32
    %8 = arith.cmpi ne, %7, %c0_i32_4 : i32
    scf.if %8 {
      %c0 = arith.constant 0 : index
      %c0_5 = arith.constant 0 : index
      %9 = vector.load %arg1[%c0, %c0_5] : memref<2x1000xf32, #tpu.memory_space<vmem>>, vector<2x1000xf32>
      %c0_6 = arith.constant 0 : index
      %c0_7 = arith.constant 0 : index
      %10 = vector.load %arg2[%c0_6, %c0_7] : memref<2x1000xf32, #tpu.memory_space<vmem>>, vector<2x1000xf32>
      %cst = arith.constant 0.000000e+00 : f32
      %11 = vector.broadcast %cst : f32 to vector<2x1000xf32>
      %12 = arith.subf %11, %9 : vector<2x1000xf32>
      %13 = arith.mulf %12, %10 : vector<2x1000xf32>
      %cst_8 = arith.constant 0.000000e+00 : f32
      %14 = vector.broadcast %cst_8 : f32 to vector<2x1000xf32>
      %15 = arith.maximumf %13, %14 : vector<2x1000xf32>
      %16 = math.absf %9 : vector<2x1000xf32>
      %cst_9 = arith.constant 0.000000e+00 : f32
      %17 = vector.broadcast %cst_9 : f32 to vector<2x1000xf32>
      %18 = arith.subf %17, %16 : vector<2x1000xf32>
      %19 = math.exp %18 : vector<2x1000xf32>
      %20 = math.log1p %19 : vector<2x1000xf32>
      %21 = arith.addf %15, %20 : vector<2x1000xf32>
      %22 = arith.mulf %10, %10 : vector<2x1000xf32>
      %cst_10 = arith.constant 0.000000e+00 : f32
      %23 = vector.broadcast %cst_10 : f32 to vector<2x1000xf32>
      %24 = arith.cmpf ogt, %22, %23 : vector<2x1000xf32>
      %cst_11 = arith.constant 0.000000e+00 : f32
      %25 = vector.broadcast %cst_11 : f32 to vector<2x1000xf32>
      %26 = arith.select %24, %21, %25 : vector<2x1000xi1>, vector<2x1000xf32>
      %27 = arith.extui %24 : vector<2x1000xi1> to vector<2x1000xi32>
      %28 = arith.sitofp %27 : vector<2x1000xi32> to vector<2x1000xf32>
      %c0_12 = arith.constant 0 : index
      %c0_13 = arith.constant 0 : index
      %29 = vector.load %arg4[%c0_12, %c0_13] : memref<2x1000xf32, #tpu.memory_space<vmem>>, vector<2x1000xf32>
      %30 = arith.addf %29, %26 : vector<2x1000xf32>
      %c0_14 = arith.constant 0 : index
      %c0_15 = arith.constant 0 : index
      %31 = vector.load %arg4[%c0_14, %c0_15] : memref<2x1000xf32, #tpu.memory_space<vmem>>, vector<2x1000xf32>
      tpu.vector_store %arg4[%c0_14, %c0_15], %30 {strides = array<i32>} : memref<2x1000xf32, #tpu.memory_space<vmem>>, vector<2x1000xf32>,
      %c0_16 = arith.constant 0 : index
      %c0_17 = arith.constant 0 : index
      %32 = vector.load %arg5[%c0_16, %c0_17] : memref<2x1000xf32, #tpu.memory_space<vmem>>, vector<2x1000xf32>
      %33 = arith.addf %32, %28 : vector<2x1000xf32>
      %c0_18 = arith.constant 0 : index
      %c0_19 = arith.constant 0 : index
      %34 = vector.load %arg5[%c0_18, %c0_19] : memref<2x1000xf32, #tpu.memory_space<vmem>>, vector<2x1000xf32>
      tpu.vector_store %arg5[%c0_18, %c0_19], %33 {strides = array<i32>} : memref<2x1000xf32, #tpu.memory_space<vmem>>, vector<2x1000xf32>,
      %c0_20 = arith.constant 0 : index
      %c0_21 = arith.constant 0 : index
      %35 = vector.load %arg4[%c0_20, %c0_21] : memref<2x1000xf32, #tpu.memory_space<vmem>>, vector<2x1000xf32>
      %36 = vector.shape_cast %35 : vector<2x1000xf32> to vector<1x2x1000xf32>
      %cst_22 = arith.constant dense<0.000000e+00> : vector<1xf32>
      %37 = vector.multi_reduction <add>, %36, %cst_22 [1, 2] : vector<1x2x1000xf32> to vector<1xf32>
      %38 = vector.shape_cast %37 : vector<1xf32> to vector<1x1x1xf32>
      %39 = vector.extract %38[0, 0, 0] : f32 from vector<1x1x1xf32>
      %c0_23 = arith.constant 0 : index
      %40 = memref.load %arg3[%c0_23] : memref<2xf32, #tpu.memory_space<smem>>
      memref.store %39, %arg3[%c0_23] : memref<2xf32, #tpu.memory_space<smem>>
      %c0_24 = arith.constant 0 : index
      %c0_25 = arith.constant 0 : index
      %41 = vector.load %arg5[%c0_24, %c0_25] : memref<2x1000xf32, #tpu.memory_space<vmem>>, vector<2x1000xf32>
      %42 = vector.shape_cast %41 : vector<2x1000xf32> to vector<1x2x1000xf32>
      %cst_26 = arith.constant dense<0.000000e+00> : vector<1xf32>
      %43 = vector.multi_reduction <add>, %42, %cst_26 [1, 2] : vector<1x2x1000xf32> to vector<1xf32>
      %44 = vector.shape_cast %43 : vector<1xf32> to vector<1x1x1xf32>
      %45 = vector.extract %44[0, 0, 0] : f32 from vector<1x1x1xf32>
      %c1 = arith.constant 1 : index
      %46 = memref.load %arg3[%c1] : memref<2xf32, #tpu.memory_space<smem>>
      memref.store %45, %arg3[%c1] : memref<2xf32, #tpu.memory_space<smem>>
    } else {
    }
    return
  }
  func.func @transform_0(%arg0: i32) -> (i32, i32) {
    %c0_i32 = arith.constant 0 : i32
    %c0_i32_0 = arith.constant 0 : i32
    return %arg0, %c0_i32 : i32, i32
  }
  func.func @transform_1(%arg0: i32) -> (i32, i32) {
    %c0_i32 = arith.constant 0 : i32
    %c0_i32_0 = arith.constant 0 : i32
    return %arg0, %c0_i32 : i32, i32
  }
  func.func @transform_2(%arg0: i32) -> i32 {
    %c0_i32 = arith.constant 0 : i32
    %c0_i32_0 = arith.constant 0 : i32
    return %c0_i32 : i32
  }
}

</mosaic_0001>

<bundles_post_ra>
// kernel: classification_loss.1
= control target key start
LH: loop header
LB: loop body
LE: loop exit
PB: predicated region body
PF: predicated region fallthrough
CT: control target
= control target key end

     0   :  { %7 = vsyncpa [#allocation5], 0  ;;  %s517_s0 = inlined_call_operand.hbm [shape: f32[2,1000], index: 0, kind: input, shape index: {}]   ;;  %s518_s1 = inlined_call_operand.hbm [shape: f32[2,1000], index: 1, kind: input, shape index: {}]   ;;  %s519_s2 = inlined_call_operand.vmem [shape: f32[2], index: 2, kind: output, shape index: {}]  }
   0x1   :  { %8 = vsyncpa [#allocation8], 0 }
   0x2   :  { %9 = vsyncpa [#allocation6], 0  ;;  %s439_s9 = smov [#allocation4]   ;;  %s440_s11 = smov [#allocation7]  }
   0x3   :  { %s16_s10 = sshll.u32 %s439_s9, 4  ;;  %s26_s12 = sshll.u32 %s440_s11, 4  ;;  %s17_s10 = int_to_ptr.vmem [resolvable:$true] %s16_s10  ;;  %s27_s12 = int_to_ptr.vmem [resolvable:$true] %s26_s12 }
   0x4   :  { %s377_s15 = scalar_lea.hbm %s517_s0, 256 }
   0x5   :  { %p378_p0 = scmp.ne.s32.totalorder %s517_s0, %s377_s15  ;;  %p381_p1 = scmp.lt.u32.totalorder %s377_s15, %s517_s0 }
   0x7   :  { %p383_p2 = pnand %p381_p1, %p378_p0 }
   0x9   :  { %386 = shalt.err (!%p383_p2)
}
   0xa   :  { %s387_s20 = scalar_lea.vmem %s17_s10, 256  ;;  %p392_p4 = scmp.lt.s32.totalorder %s17_s10, %s17_s10 }
   0xb   :  { %p388_p3 = scmp.ne.s32.totalorder %s17_s10, %s387_s20  ;;  %p393_p5 = scmp.lt.s32.totalorder %s387_s20, %s387_s20 }
   0xd   :  { %p394_p6 = por %p393_p5, %p392_p4 }
   0xf   :  { %p395_p7 = pnand %p394_p6, %p388_p3 }
  0x11   :  { %398 = shalt.err (!%p395_p7)
}
  0x12   :  { %19 = dma.hbm_to_vmem [thread:$0]  %s517_s0, 256, %s17_s10, [#allocation5]  }
  0x13   :  { %s399_s25 = scalar_lea.hbm %s518_s1, 256 }
  0x14   :  { %p400_p8 = scmp.ne.s32.totalorder %s518_s1, %s399_s25  ;;  %p403_p9 = scmp.lt.u32.totalorder %s399_s25, %s518_s1 }
  0x16   :  { %p405_p10 = pnand %p403_p9, %p400_p8 }
  0x18   :  { %408 = shalt.err (!%p405_p10)
}
  0x19   :  { %s409_s30 = scalar_lea.vmem %s27_s12, 256  ;;  %p414_p12 = scmp.lt.s32.totalorder %s27_s12, %s27_s12 }
  0x1a   :  { %p410_p11 = scmp.ne.s32.totalorder %s27_s12, %s409_s30  ;;  %p415_p13 = scmp.lt.s32.totalorder %s409_s30, %s409_s30 }
  0x1c   :  { %p416_p0 = por %p415_p13, %p414_p12 }
  0x1e   :  { %p417_p1 = pnand %p416_p0, %p410_p11 }
  0x20   :  { %420 = shalt.err (!%p417_p1)
}
  0x21   :  { %29 = dma.hbm_to_vmem [thread:$0]  %s518_s1, 256, %s27_s12, [#allocation8]  }
  0x22   :  { %433 = dma.done.wait [#allocation5], 256  }
  0x23   :  { %434 = vsyncadd [#allocation5], 4294967040 }
  0x24   :  { %435 = dma.done.wait [#allocation8], 256  }
  0x25   :  { %436 = vsyncadd [#allocation8], 4294967040  ;;  %vm41_vm0 = vcmask 1041408   ;;  %vm42_vm1 = vcmask 1043458   ;;  %vm44_vm2 = vcmask 1045508   ;;  %vm46_vm4 = vcmask 850950  }
  0x26   :  { %vm43_vm3 = vmor %vm42_vm1, %vm41_vm0  ;;  %v441_v1 = vmov 0.0   ;;  %v125_v2 = vld [vmem:[#allocation4] sm:$0xff]  ;;  %v126_v3 = vld [vmem:[#allocation4 + $0x8] sm:$0xff]  ;;  %v442_v18 = vmov 1983009808   ;;  %v200_v20 = vlaneseq  ;;  %vm251_vm11 = vcmask 844800  }
  0x27   :  { %vm45_vm5 = vmor %vm44_vm2, %vm43_vm3  ;;  %v127_v4 = vld [vmem:[#allocation7] sm:$0xff]  ;;  %v128_v5 = vld [vmem:[#allocation7 + $0x8] sm:$0xff]  ;;  %v135_v6 = vand.u32 2147483647, %v125_v2  ;;  %v136_v8 = vand.u32 2147483647, %v126_v3  ;;  %v198_v19 = vunpack.c.l.s4 %v442_v18 }
  0x28   :  { %vm484_vm6 = vmor %vm46_vm4, %vm45_vm5  ;;  %v163_v7 = vmul.f32 %v127_v4, %v127_v4  ;;  %v164_v9 = vmul.f32 %v128_v5, %v128_v5  ;;  %v201_v25 = vshrl.u32 %v200_v20, 7  ;;  %v129_v28 = vsub.f32 0.0, %v125_v2  ;;  %s343_s6 = sshll.u32 %s519_s2, 4  ;;  %s344_s6 = int_to_ptr.vmem [resolvable:$true] %s343_s6 }
  0x29   :  { %48 = vst.msk [vmem:[#allocation2 + $0x8] sm:$0xff] %vm484_vm6, %v441_v1  ;;  %50 = vst.msk [vmem:[#allocation3 + $0x8] sm:$0xff] %vm484_vm6, %v441_v1  ;;  %v137_v10 = vsub.f32 0.0, %v135_v6  ;;  %v138_v11 = vsub.f32 0.0, %v136_v8  ;;  %v199_v24 = vunpack.c.0.s8 %v198_v19  ;;  %v130_v31 = vsub.f32 0.0, %v126_v3  ;;  %s421_s8 = scalar_lea.vmem %s344_s6, 16  ;;  %p426_p3 = scmp.lt.s32.totalorder %s344_s6, %s344_s6 }
  0x2a   :  { %vm165_vm7 = vcmp.gt.f32.partialorder %v163_v7, 0.0  ;;  %vm166_vm8 = vcmp.gt.f32.partialorder %v164_v9, 0.0  ;;  %v131_v34 = vmul.f32 %v129_v28, %v127_v4  ;;  %p422_p2 = scmp.ne.s32.totalorder %s344_s6, %s421_s8  ;;  %p427_p4 = scmp.lt.s32.totalorder %s421_s8, %s421_s8 }
  0x2b   :  { %v356_v12 = vsel %vm165_vm7, 1.0, %v441_v1  ;;  %v139_v14 = vmul.f32 1.442695, %v137_v10  ;;  %v357_v15 = vsel %vm166_vm8, 1.0, %v441_v1  ;;  %v141_v16 = vmul.f32 1.442695, %v138_v11 }
  0x2c   :  { %v202_v30 = vsub.s32 %v199_v24, %v201_v25  ;;  %v132_v37 = vmul.f32 %v130_v31, %v128_v5  ;;  %v269_v39 = vcombine.high %v356_v12, %v356_v12  ;;  %v133_v43 = vmax.f32 %v131_v34, 0.0  ;;  %p428_p5 = por %p427_p4, %p426_p3 }
  0x2d   :  { %369 = vpow2.f32 %v139_v14 }
  0x2e   :  { %371 = vpow2.f32 %v141_v16  ;;  %v276_v32 = vrot.slane %v356_v12, %v202_v30  ;;  %v134_v46 = vmax.f32 %v132_v37, 0.0  ;;  %v283_v49 = vrot.slane %v269_v39, %v202_v30  ;;  %p429_p6 = pnand %p428_p5, %p422_p2 }
  0x30   :  { %v187_v13 = vld [vmem:[#allocation3 + $0x8] sm:$0xff]  ;;  %v284_v40 = vcombine.high %v276_v32, %v276_v32  ;;  %v311_v50 = vsel %vm41_vm0, %v276_v32, 0.0  ;;  %v174_v56 = vld [vmem:[#allocation2 + $0x8] sm:$0xff]  ;;  %v285_v59 = vcombine.high %v283_v49, %v283_v49  ;;  %v314_v60 = vsel %vm41_vm0, %v283_v49, 0.0 }
  0x31   :  { %v189_v17 = vadd.f32 %v357_v15, %v187_v13 }
  0x32   :  { %v312_v51 = vsel %vm41_vm0, %v284_v40, 0.0  ;;  %v316_v5 = vsel %vm41_vm0, %v285_v59, 0.0 }
  0x33   :  { %191 = vst.msk [vmem:[#allocation3 + $0x8] sm:$0xff] %vm484_vm6, %v189_v17  ;;  %v313_v57 = vadd.f32 %v312_v51, %v311_v50 }
  0x35   :  { %v315_v3 = vadd.f32 %v314_v60, %v313_v57 }
  0x37   :  { %v370_v21 = vpop.eup %369  ;;  %v317_v13 = vadd.f32 %v316_v5, %v315_v3 }
  0x38   :  { %v372_v22 = vpop.eup %371  ;;  %v143_v23 = vadd.f32 1.0, %v370_v21  ;;  %v146_v27 = vmul.f32 -0.5, %v370_v21  ;;  %v149_v35 = vand.u32 2147483647, %v370_v21 }
  0x39   :  { %v152_v26 = vadd.f32 1.0, %v372_v22  ;;  %v155_v29 = vmul.f32 -0.5, %v372_v22  ;;  %v158_v38 = vand.u32 2147483647, %v372_v22 }
  0x3a   :  { %373 = vlog2.f32 %v143_v23  ;;  %v147_v33 = vadd.f32 1.0, %v146_v27  ;;  %vm150_vm9 = vcmp.lt.f32.partialorder %v149_v35, 0.0004427343  ;;  %v266_v62 = vld [vmem:[#allocation3 + $0x8] sm:$0xff] }
  0x3b   :  { %375 = vlog2.f32 %v152_v26  ;;  %v156_v36 = vadd.f32 1.0, %v155_v29  ;;  %vm159_vm10 = vcmp.lt.f32.partialorder %v158_v38, 0.0004427343  ;;  %v293_v4 = vrot.slane %v266_v62, %v202_v30 }
  0x3c   :  { %v148_v41 = vmul.f32 %v370_v21, %v147_v33  ;;  %v286_v10 = vcombine.high %v266_v62, %v266_v62 }
  0x3d   :  { %v157_v44 = vmul.f32 %v372_v22, %v156_v36  ;;  %v301_v15 = vcombine.high %v293_v4, %v293_v4  ;;  %v318_v16 = vsel %vm41_vm0, %v293_v4, 0.0 }
  0x3e   :  { %v300_v19 = vrot.slane %v286_v10, %v202_v30  ;;  %v319_v20 = vadd.f32 %v318_v16, %v317_v13 }
  0x3f   :  { %v320_v24 = vsel %vm41_vm0, %v301_v15, 0.0 }
  0x40   :  { %v302_v29 = vcombine.high %v300_v19, %v300_v19  ;;  %v321_v31 = vadd.f32 %v320_v24, %v319_v20  ;;  %v322_v35 = vsel %vm41_vm0, %v300_v19, 0.0 }
  0x42   :  { %v323_v39 = vadd.f32 %v322_v35, %v321_v31  ;;  %v324_v40 = vsel %vm251_vm11, %v302_v29, 0.0 }
  0x44   :  { %v374_v42 = vpop.eup %373 }
  0x45   :  { %v376_v45 = vpop.eup %375  ;;  %v145_v47 = vmul.f32 0.6931472, %v374_v42 }
  0x46   :  { %v154_v48 = vmul.f32 0.6931472, %v376_v45 }
  0x47   :  { %v151_v52 = vsel %vm150_vm9, %v148_v41, %v145_v47  ;;  %v325_v41 = vadd.f32 %v324_v40, %v323_v39 }
  0x48   :  { %v160_v53 = vsel %vm159_vm10, %v157_v44, %v154_v48  ;;  %v161_v54 = vadd.f32 %v151_v52, %v133_v43 }
  0x49   :  { %v162_v55 = vadd.f32 %v160_v53, %v134_v46 }
  0x4a   :  { %v167_v58 = vsel %vm165_vm7, %v161_v54, 0.0 }
  0x4b   :  { %v168_v61 = vsel %vm166_vm8, %v162_v55, 0.0  ;;  %v196_v1 = vcombine.high %v167_v58, %v167_v58  ;;  %v203_v2 = vrot.slane %v167_v58, %v202_v30 }
  0x4c   :  { %v176_v63 = vadd.f32 %v174_v56, %v168_v61 }
  0x4d   :  { %v210_v6 = vrot.slane %v196_v1, %v202_v30  ;;  %v211_v8 = vcombine.high %v203_v2, %v203_v2  ;;  %v238_v7 = vsel %vm41_vm0, %v203_v2, 0.0 }
  0x4e   :  { %185 = vst.msk [vmem:[#allocation2 + $0x8] sm:$0xff] %vm484_vm6, %v176_v63 }
  0x4f   :  { %v212_v11 = vcombine.high %v210_v6, %v210_v6  ;;  %v239_v9 = vsel %vm41_vm0, %v211_v8, 0.0  ;;  %v241_v12 = vsel %vm41_vm0, %v210_v6, 0.0 }
  0x50   :  { %v240_v14 = vadd.f32 %v239_v9, %v238_v7 }
  0x51   :  { %v243_v0 = vsel %vm41_vm0, %v212_v11, 0.0 }
  0x52   :  { %v242_v17 = vadd.f32 %v241_v12, %v240_v14 }
  0x54   :  { %v244_v23 = vadd.f32 %v243_v0, %v242_v17 }
  0x55   :  { %v193_v18 = vld [vmem:[#allocation2 + $0x8] sm:$0xff] }
  0x56   :  { %v213_v21 = vcombine.high %v193_v18, %v193_v18  ;;  %v220_v22 = vrot.slane %v193_v18, %v202_v30 }
  0x58   :  { %v227_v25 = vrot.slane %v213_v21, %v202_v30  ;;  %v228_v26 = vcombine.high %v220_v22, %v220_v22  ;;  %v245_v27 = vsel %vm41_vm0, %v220_v22, 0.0 }
  0x59   :  { %v246_v28 = vadd.f32 %v245_v27, %v244_v23 }
  0x5a   :  { %v229_v32 = vcombine.high %v227_v25, %v227_v25  ;;  %v247_v33 = vsel %vm41_vm0, %v228_v26, 0.0  ;;  %v249_v34 = vsel %vm41_vm0, %v227_v25, 0.0 }
  0x5b   :  { %v248_v36 = vadd.f32 %v247_v33, %v246_v28 }
  0x5c   :  { %v252_v37 = vsel %vm251_vm11, %v229_v32, 0.0 }
  0x5d   :  { %v250_v38 = vadd.f32 %v249_v34, %v248_v36 }
  0x5f   :  { %v253_v30 = vadd.f32 %v252_v37, %v250_v38 }
  0x61   :  { %254 = vadd.xlane.f32.xlu0 %v253_v30 }
  0x65   :  { %326 = vadd.xlane.f32.xlu0 %v325_v41 }
  0xee   :  { %v255_v42 = vpop.xlane.xlu0 %254 }
  0xef   :  { %v256_v43 = vrot.slane %v255_v42, 4 }
  0xf1   :  { %v257_v44 = vadd.f32 %v256_v43, %v255_v42 }
  0xf2   :  { %v327_v45 = vpop.xlane.xlu0 %326 }
  0xf3   :  { %v258_v46 = vrot.slane %v257_v44, 2  ;;  %v328_v47 = vrot.slane %v327_v45, 4 }
  0xf5   :  { %v329_v48 = vadd.f32 %v328_v47, %v327_v45  ;;  %v259_v49 = vadd.f32 %v258_v46, %v257_v44 }
  0xf7   :  { %v330_v50 = vrot.slane %v329_v48, 2  ;;  %v260_v51 = vrot.slane %v259_v49, 1 }
  0xf9   :  { %v331_v52 = vadd.f32 %v330_v50, %v329_v48  ;;  %v261_v53 = vadd.f32 %v260_v51, %v259_v49 }
  0xfb   :  { %358 = vpush %v261_v53  ;;  %v332_v54 = vrot.slane %v331_v52, 1 }
  0xfd   :  { %v333_v55 = vadd.f32 %v332_v54, %v331_v52 }
  0xff   :  { %360 = vpush %v333_v55 }
 0x12c   :  { %s359_s1 = spop %358 }
 0x12d   :  { %264 = sst [smem:[#allocation9]] %s359_s1 }
 0x130   :  { %s361_s7 = spop %360 }
 0x131   :  { %336 = sst [smem:[#allocation9 + $0x1]] %s361_s7 }
 0x132   :  { %432 = shalt.err (!%p429_p6)
}
 0x133   :  { %s443_s9 = smov [#allocation9]  }
 0x134   :  { %346 = dma.smem_to_vmem %s443_s9, 16, %s344_s6, [#allocation6]  }
 0x135   :  { %437 = dma.done.wait [#allocation6], 16  }
 0x136   :  { %438 = vsyncadd [#allocation6], 4294967280 }
 0x137   :  { %350 = sfence }
 0x138   :  { %351 = vsyncpa [#allocation5], 1 }
 0x139   :  { %352 = vsyncpa [#allocation8], 1 }
 0x13a   :  { %353 = vsyncpa [#allocation6], 1 }

</bundles_post_ra>
